<compile_context>
chip_gen: v5e
topology: v5e:2x2
jax: 0.10.0
libtpu: 0.0.40
codegen_flags: <defaults>
</compile_context>

<pallas_src>
import functools
import math

import jax
import jax.numpy as jnp
from jax import lax
from jax.experimental import pallas as pl
from jax.experimental.pallas import tpu as pltpu

BN_EPS = 1e-5

# bf16 MXU operands (f32 accumulation): halves conv-input DMA bytes and feeds the
# 256^2 bf16 MXU on v6e/v7x at full rate.  Default False so the script stays
# bit-comparable with the f32 PyTorch reference at tight tolerances.
USE_BF16_MXU = False

# Scoped-VMEM request: legal on v5e/v6e (128 MiB physical) and v7x (64 MiB physical),
# and raises v5e's 16 MiB default.
VMEM_LIMIT_BYTES = 32 * 1024 * 1024

# Per-block VMEM budget used when sizing the batch block (blocks are double-buffered
# by the pipeline, so stay well under VMEM_LIMIT_BYTES).
BLOCK_BUDGET_BYTES = 4 * 1024 * 1024


def _activate(z, activation):
    if activation == "relu":
        return jnp.maximum(z, jnp.float32(0.0))
    if activation == "tanh":
        return jnp.tanh(z)
    raise ValueError("Use valid activation function.")


def _conv_row(x_ref, w_ref, n, *, K, padding, L_out, mxu_dtype):
    """Conv output (Cout, L_out) f32 for batch row `n` of the current block.

    Builds the zero-padded, K-stacked window in VMEM (VMEM-local, unlike im2col) and
    contracts over Cin*K in a single MXU dot.
    """
    x_n = x_ref[n]                                            # (Cin, L)
    Cin, _ = x_n.shape
    if padding > 0:
        zpad = jnp.zeros((Cin, padding), x_n.dtype)
        xp = jnp.concatenate([zpad, x_n, zpad], axis=1)       # (Cin, L + 2*padding)
    else:
        xp = x_n
    # Stack the K shifted windows on sublanes -> one contraction of length Cin*K.
    xstk = jnp.concatenate([xp[:, k:k + L_out] for k in range(K)], axis=0)
    return jnp.dot(w_ref[...], xstk.astype(mxu_dtype),
                   preferred_element_type=jnp.float32)        # (Cout, L_out)


def _conv_stats_kernel(x_ref, w_ref, sum_ref, css_ref, *,
                       K, padding, L_out, Bn, mxu_dtype):
    """Call A (Cout > Cin branch): conv -> per-row partial BN statistics only."""
    inv_l = jnp.float32(1.0 / L_out)
    for n in range(Bn):                                       # static unroll, Bn small
        acc = _conv_row(x_ref, w_ref, n, K=K, padding=padding, L_out=L_out,
                        mxu_dtype=mxu_dtype)
        s = jnp.sum(acc, axis=1, keepdims=True)               # (Cout, 1) row sum
        d = acc - s * inv_l                                   # centered on row mean
        sum_ref[n] = s
        css_ref[n] = jnp.sum(d * d, axis=1, keepdims=True)    # centered sum of squares


def _conv_stats_y_kernel(x_ref, w_ref, y_ref, sum_ref, css_ref, *,
                         K, padding, L_out, Bn, mxu_dtype):
    """Call A (Cout <= Cin branch): conv -> store un-normalized y + partial stats."""
    inv_l = jnp.float32(1.0 / L_out)
    for n in range(Bn):
        acc = _conv_row(x_ref, w_ref, n, K=K, padding=padding, L_out=L_out,
                        mxu_dtype=mxu_dtype)
        y_ref[n] = acc.astype(y_ref.dtype)
        s = jnp.sum(acc, axis=1, keepdims=True)
        d = acc - s * inv_l
        sum_ref[n] = s
        css_ref[n] = jnp.sum(d * d, axis=1, keepdims=True)


def _conv_affine_act_kernel(x_ref, w_ref, scale_ref, shift_ref, o_ref, *,
                            K, padding, L_out, Bn, activation, mxu_dtype):
    """Call B (recompute branch) and the norm=False path: conv + affine + act."""
    scale = scale_ref[...]                                    # (Cout, 1), precomputed
    shift = shift_ref[...]
    for n in range(Bn):
        acc = _conv_row(x_ref, w_ref, n, K=K, padding=padding, L_out=L_out,
                        mxu_dtype=mxu_dtype)
        z = acc * scale + shift
        o_ref[n] = _activate(z, activation).astype(o_ref.dtype)


def _affine_act_kernel(y_ref, scale_ref, shift_ref, o_ref, *, activation, Bn):
    """Call B (read-back branch): pure elementwise scale/shift + activation."""
    scale = scale_ref[...]
    shift = shift_ref[...]
    for n in range(Bn):
        o_ref[n] = _activate(y_ref[n] * scale + shift, activation).astype(o_ref.dtype)


def _pick_batch_block(N, cin, per_row_bytes):
    """Smallest batch block that fills the 8 f32 sublanes, capped by a VMEM budget
    and rounded down to a divisor of N (ragged-free grid, maximal pipelining)."""
    want = max(1, -(-8 // max(cin, 1)))                       # ceil(8 / Cin)
    cap = max(1, int(BLOCK_BUDGET_BYTES // max(per_row_bytes, 1)))
    bn = max(1, min(N, want, cap))
    while N % bn:
        bn -= 1
    return bn


def _bn_scale_shift(row_sum, row_css, gamma, beta, l_out, eps):
    """Combine per-row partials into the fused BN affine (computed once, in XLA).

    row_sum/row_css: (N, Cout, 1).  var uses Chan-style combination of row-centered
    sums of squares (numerically robust vs. global E[x^2] - E[x]^2).
    """
    s = row_sum[:, :, 0]                                      # (N, Cout)
    q = row_css[:, :, 0]
    n_rows = s.shape[0]
    n_total = n_rows * l_out
    row_mean = s / l_out
    mean = jnp.sum(s, axis=0) / n_total                       # (Cout,)
    var = (jnp.sum(q, axis=0)
           + l_out * jnp.sum((row_mean - mean[None, :]) ** 2, axis=0)) / n_total
    scale = gamma * lax.rsqrt(var + eps)
    shift = beta - mean * scale
    return (scale.reshape(-1, 1).astype(jnp.float32),
            shift.reshape(-1, 1).astype(jnp.float32))


def conv_block_forward(x, weight, bias, gamma, beta, *, kernel_size, pad="same",
                       norm=True, activation="relu"):
    """ConvBlock forward.  x: (N, Cin, L) f32, weight: (Cout, Cin, K),
    bias/gamma/beta: (Cout,).  Returns (N, Cout, L_out) f32 in NCL layout."""
    if activation not in ("relu", "tanh"):
        raise ValueError("Use valid activation function.")
    N, Cin, L = x.shape
    Cout, Cin_w, K = weight.shape
    assert Cin_w == Cin and K == kernel_size

    if pad == "same":                      # Conv1dSame, stride=1, dilation=1
        cut_last = (K % 2 == 0)
        padding = math.ceil((K - 1) / 2)
        has_bias = True                    # Conv1dSame keeps the default Conv1d bias
    else:
        cut_last = False
        padding = int(pad)
        has_bias = False                   # ConvBlock uses Conv1d(..., bias=False)

    L_full = L + 2 * padding - K + 1
    L_out = L_full - 1 if cut_last else L_full
    # Only the first L_out conv columns are ever computed, so for even K the trimmed
    # column never enters the BN batch statistics (matches PyTorch).

    mxu_dtype = jnp.bfloat16 if USE_BF16_MXU else jnp.float32
    # (Cout, K*Cin); column index = k*Cin + ci, matching the in-kernel stacking order.
    w_mat = jnp.transpose(weight, (0, 2, 1)).reshape(Cout, K * Cin).astype(mxu_dtype)

    per_row_bytes = 4 * (2 * Cin * L + 2 * Cout * L_out + (K * Cin + Cout) * L_out)
    Bn = _pick_batch_block(N, Cin, per_row_bytes)
    GB = N // Bn

    cparams = pltpu.CompilerParams(
        dimension_semantics=("parallel",),          # every call is megacore-splittable
        vmem_limit_bytes=VMEM_LIMIT_BYTES)

    x_spec = pl.BlockSpec((Bn, Cin, L), lambda g: (g, 0, 0))
    w_spec = pl.BlockSpec((Cout, K * Cin), lambda g: (0, 0))
    col_spec = pl.BlockSpec((Cout, 1), lambda g: (0, 0))
    y_spec = pl.BlockSpec((Bn, Cout, L_out), lambda g: (g, 0, 0))
    stat_spec = pl.BlockSpec((Bn, Cout, 1), lambda g: (g, 0, 0))

    out_y = jax.ShapeDtypeStruct((N, Cout, L_out), jnp.float32)
    out_stat = jax.ShapeDtypeStruct((N, Cout, 1), jnp.float32)

    conv_flops = 2 * N * Cout * L_out * Cin * K
    tanh_count = N * Cout * L_out if activation == "tanh" else 0
    x_bytes = N * Cin * L * x.dtype.itemsize
    w_bytes = w_mat.size * w_mat.dtype.itemsize
    y_bytes = N * Cout * L_out * 4
    stat_bytes = 2 * N * Cout * 4

    if not norm:
        # Single fused call: conv + bias + activation.
        shift = (bias.reshape(Cout, 1).astype(jnp.float32)
                 if (has_bias and bias is not None)
                 else jnp.zeros((Cout, 1), jnp.float32))
        scale = jnp.ones((Cout, 1), jnp.float32)
        return pl.pallas_call(
            functools.partial(_conv_affine_act_kernel, K=K, padding=padding,
                              L_out=L_out, Bn=Bn, activation=activation,
                              mxu_dtype=mxu_dtype),
            out_shape=out_y,
            grid_spec=pltpu.PrefetchScalarGridSpec(
                num_scalar_prefetch=0, grid=(GB,),
                in_specs=[x_spec, w_spec, col_spec, col_spec],
                out_specs=y_spec),
            compiler_params=cparams,
            cost_estimate=pl.CostEstimate(
                flops=conv_flops, transcendentals=tanh_count,
                bytes_accessed=x_bytes + w_bytes + y_bytes),
        )(x, w_mat, scale, shift)

    gamma_f = gamma.astype(jnp.float32)
    beta_f = beta.astype(jnp.float32)
    # Conv bias is intentionally dropped: BN's mean subtraction cancels it exactly.

    if Cout <= Cin:
        # Write-then-read branch: x read once; un-normalized y stored by call A and
        # normalized in place by call B (pure elementwise, no conv recompute).
        y_raw, row_sum, row_css = pl.pallas_call(
            functools.partial(_conv_stats_y_kernel, K=K, padding=padding,
                              L_out=L_out, Bn=Bn, mxu_dtype=mxu_dtype),
            out_shape=(out_y, out_stat, out_stat),
            grid_spec=pltpu.PrefetchScalarGridSpec(
                num_scalar_prefetch=0, grid=(GB,),
                in_specs=[x_spec, w_spec],
                out_specs=(y_spec, stat_spec, stat_spec)),
            compiler_params=cparams,
            cost_estimate=pl.CostEstimate(
                flops=conv_flops, transcendentals=0,
                bytes_accessed=x_bytes + w_bytes + y_bytes + stat_bytes),
        )(x, w_mat)
        scale, shift = _bn_scale_shift(row_sum, row_css, gamma_f, beta_f, L_out, BN_EPS)
        return pl.pallas_call(
            functools.partial(_affine_act_kernel, activation=activation, Bn=Bn),
            out_shape=out_y,
            grid_spec=pltpu.PrefetchScalarGridSpec(
                num_scalar_prefetch=0, grid=(GB,),
                in_specs=[y_spec, col_spec, col_spec],
                out_specs=y_spec),
            compiler_params=cparams,
            input_output_aliases={0: 0},             # normalize y_raw in place
            cost_estimate=pl.CostEstimate(
                flops=2 * N * Cout * L_out, transcendentals=tanh_count,
                bytes_accessed=2 * y_bytes),
        )(y_raw, scale, shift)

    # Cout > Cin: re-running the memory-bound conv is cheaper than 3x y traffic, and
    # keeps both calls fully parallel.  Output is written exactly once.
    row_sum, row_css = pl.pallas_call(
        functools.partial(_conv_stats_kernel, K=K, padding=padding, L_out=L_out,
                          Bn=Bn, mxu_dtype=mxu_dtype),
        out_shape=(out_stat, out_stat),
        grid_spec=pltpu.PrefetchScalarGridSpec(
            num_scalar_prefetch=0, grid=(GB,),
            in_specs=[x_spec, w_spec],
            out_specs=(stat_spec, stat_spec)),
        compiler_params=cparams,
        cost_estimate=pl.CostEstimate(
            flops=conv_flops, transcendentals=0,
            bytes_accessed=x_bytes + w_bytes + stat_bytes),
    )(x, w_mat)
    scale, shift = _bn_scale_shift(row_sum, row_css, gamma_f, beta_f, L_out, BN_EPS)
    return pl.pallas_call(
        functools.partial(_conv_affine_act_kernel, K=K, padding=padding,
                          L_out=L_out, Bn=Bn, activation=activation,
                          mxu_dtype=mxu_dtype),
        out_shape=out_y,
        grid_spec=pltpu.PrefetchScalarGridSpec(
            num_scalar_prefetch=0, grid=(GB,),
            in_specs=[x_spec, w_spec, col_spec, col_spec],
            out_specs=y_spec),
        compiler_params=cparams,
        cost_estimate=pl.CostEstimate(
            flops=conv_flops + 2 * N * Cout * L_out, transcendentals=tanh_count,
            bytes_accessed=x_bytes + w_bytes + y_bytes),
    )(x, w_mat, scale, shift)


def _reference_forward(x, weight, bias, gamma, beta, *, kernel_size, pad, norm,
                       activation):
    """Pure-jnp reference mirroring the PyTorch ConvBlock forward."""
    N, Cin, L = x.shape
    Cout, _, K = weight.shape
    if pad == "same":
        cut_last = (K % 2 == 0)
        padding = math.ceil((K - 1) / 2)
        has_bias = True
    else:
        cut_last = False
        padding = int(pad)
        has_bias = False
    x_pad = jnp.pad(x, ((0, 0), (0, 0), (padding, padding)))
    L_full = L + 2 * padding - K + 1
    L_out = L_full - 1 if cut_last else L_full
    y = jnp.zeros((N, Cout, L_out), jnp.float32)
    for k in range(K):
        y = y + jnp.einsum("oc,ncl->nol", weight[:, :, k], x_pad[:, :, k:k + L_out],
                           precision=lax.Precision.HIGHEST)
    if has_bias:
        y = y + bias[None, :, None]
    if norm:
        mean = jnp.mean(y, axis=(0, 2), keepdims=True)
        var = jnp.mean((y - mean) ** 2, axis=(0, 2), keepdims=True)
        y = (y - mean) / jnp.sqrt(var + BN_EPS)
        y = y * gamma[None, :, None] + beta[None, :, None]
    return jnp.maximum(y, 0.0) if activation == "relu" else jnp.tanh(y)


if __name__ == "__main__":
    def _run_case(name, N, Cin, Cout, K, pad, norm, activation, seed, L=16):
        key = jax.random.PRNGKey(seed)
        kx, kw, kb, kg, ke = jax.random.split(key, 5)
        x = jax.random.normal(kx, (N, Cin, L), dtype=jnp.float32)
        bound = 1.0 / math.sqrt(Cin * K)
        weight = jax.random.uniform(kw, (Cout, Cin, K), minval=-bound, maxval=bound,
                                    dtype=jnp.float32)
        bias = jax.random.uniform(kb, (Cout,), minval=-bound, maxval=bound,
                                  dtype=jnp.float32)
        # PyTorch BN init is gamma=1, beta=0; perturb slightly to exercise the affine.
        gamma = 1.0 + 0.1 * jax.random.normal(kg, (Cout,), dtype=jnp.float32)
        beta = 0.1 * jax.random.normal(ke, (Cout,), dtype=jnp.float32)

        fwd = jax.jit(functools.partial(conv_block_forward, kernel_size=K, pad=pad,
                                        norm=norm, activation=activation))
        out = jax.block_until_ready(fwd(x, weight, bias, gamma, beta))
        ref = _reference_forward(x, weight, bias, gamma, beta, kernel_size=K,
                                 pad=pad, norm=norm, activation=activation)
        assert out.shape == ref.shape, (name, out.shape, ref.shape)
        ok = bool(jnp.allclose(out, ref, atol=2e-4, rtol=2e-4))
        assert ok, (name, float(jnp.max(jnp.abs(out - ref))))
        return out

    # ConvBlock(4, 8, 3, pad='same', norm=True, activation='relu')
    #   Cout > Cin -> parallel stats call + recompute-conv apply call.
    _run_case("same_norm_relu", N=2, Cin=4, Cout=8, K=3, pad="same",
              norm=True, activation="relu", seed=0)
    # ConvBlock(8, 4, 4, pad='same', norm=True, activation='tanh')
    #   even K (cut_last) and Cout <= Cin -> write-y + in-place read-back apply.
    _run_case("same_norm_tanh_evenK", N=2, Cin=8, Cout=4, K=4, pad="same",
              norm=True, activation="tanh", seed=1)
    # ConvBlock(4, 8, 3, pad=1, norm=False, activation='relu')
    #   integer pad, bias=False, no norm -> single conv+activation call.
    _run_case("pad1_nonorm_relu", N=2, Cin=4, Cout=8, K=3, pad=1,
              norm=False, activation="relu", seed=2)

    print("KERNEL_OK")
</pallas_src>

<mosaic_0001>
module attributes {stable_mosaic.version = 11 : i64} {
  func.func @_conv_stats_kernel(%arg0: i32, %arg1: memref<2x4x16xf32, #tpu.memory_space<vmem>>, %arg2: memref<8x12xf32, #tpu.memory_space<vmem>>, %arg3: memref<2x8x1xf32, #tpu.memory_space<vmem>>, %arg4: memref<2x8x1xf32, #tpu.memory_space<vmem>>) attributes {dimension_semantics = [#tpu.dimension_semantics<parallel>], iteration_bounds = array<i64: 1>, scalar_prefetch = 0 : i64, scratch_operands = 0 : i64, tpu.core_type = #tpu.core_type<tc>, window_params = [{transform_indices = @transform_0, window_bounds = array<i64: 2, 4, 16>}, {pipeline_mode = #tpu.pipeline_mode<synchronous>, transform_indices = @transform_1, window_bounds = array<i64: 8, 12>}, {transform_indices = @transform_2, window_bounds = array<i64: 2, 8, 1>}, {transform_indices = @transform_3, window_bounds = array<i64: 2, 8, 1>}]} {
    %c0 = arith.constant 0 : index
    %c0_0 = arith.constant 0 : index
    %c0_1 = arith.constant 0 : index
    %0 = vector.load %arg1[%c0, %c0_0, %c0_1] : memref<2x4x16xf32, #tpu.memory_space<vmem>>, vector<1x4x16xf32>
    %1 = vector.shape_cast %0 : vector<1x4x16xf32> to vector<4x16xf32>
    %cst = arith.constant 0.000000e+00 : f32
    %2 = vector.broadcast %cst : f32 to vector<4x1xf32>
    %3 = tpu.concatenate %2, %1, %2 in 1 : vector<4x1xf32>, vector<4x16xf32>, vector<4x1xf32> -> vector<4x18xf32>
    %4 = vector.extract_strided_slice %3 {offsets = [0, 0], sizes = [4, 16], strides = [1, 1]} : vector<4x18xf32> to vector<4x16xf32>
    %5 = vector.extract_strided_slice %3 {offsets = [0, 1], sizes = [4, 16], strides = [1, 1]} : vector<4x18xf32> to vector<4x16xf32>
    %6 = vector.extract_strided_slice %3 {offsets = [0, 2], sizes = [4, 16], strides = [1, 1]} : vector<4x18xf32> to vector<4x16xf32>
    %7 = tpu.concatenate %4, %5, %6 in 0 : vector<4x16xf32>, vector<4x16xf32>, vector<4x16xf32> -> vector<12x16xf32>
    %c0_2 = arith.constant 0 : index
    %c0_3 = arith.constant 0 : index
    %8 = vector.load %arg2[%c0_2, %c0_3] : memref<8x12xf32, #tpu.memory_space<vmem>>, vector<8x12xf32>
    %cst_4 = arith.constant dense<0.000000e+00> : vector<8x16xf32>
    %9 = tpu.matmul %8, %7, %cst_4 {dimension_numbers = #tpu.dot_dimension_numbers<[1], [0], [0], [1], [0, 0, 1, 1], [], []>} : vector<8x12xf32>, vector<12x16xf32>, vector<8x16xf32> -> vector<8x16xf32>
    %cst_5 = arith.constant dense<0.000000e+00> : vector<8xf32>
    %10 = vector.multi_reduction <add>, %9, %cst_5 [1] : vector<8x16xf32> to vector<8xf32>
    %11 = vector.shape_cast %10 : vector<8xf32> to vector<8x1xf32>
    %cst_6 = arith.constant 6.250000e-02 : f32
    %12 = vector.broadcast %cst_6 : f32 to vector<8x1xf32>
    %13 = arith.mulf %11, %12 : vector<8x1xf32>
    %14 = vector.broadcast %13 : vector<8x1xf32> to vector<8x16xf32>
    %15 = arith.subf %9, %14 : vector<8x16xf32>
    %c0_7 = arith.constant 0 : index
    %c0_8 = arith.constant 0 : index
    %c0_9 = arith.constant 0 : index
    %16 = vector.load %arg3[%c0_7, %c0_8, %c0_9] : memref<2x8x1xf32, #tpu.memory_space<vmem>>, vector<1x8x1xf32>
    %17 = vector.shape_cast %16 : vector<1x8x1xf32> to vector<8x1xf32>
    %18 = vector.shape_cast %11 : vector<8x1xf32> to vector<1x8x1xf32>
    tpu.vector_store %arg3[%c0_7, %c0_8, %c0_9], %18 {strides = array<i32>} : memref<2x8x1xf32, #tpu.memory_space<vmem>>, vector<1x8x1xf32>,
    %19 = arith.mulf %15, %15 : vector<8x16xf32>
    %cst_10 = arith.constant dense<0.000000e+00> : vector<8xf32>
    %20 = vector.multi_reduction <add>, %19, %cst_10 [1] : vector<8x16xf32> to vector<8xf32>
    %21 = vector.shape_cast %20 : vector<8xf32> to vector<8x1xf32>
    %c0_11 = arith.constant 0 : index
    %c0_12 = arith.constant 0 : index
    %c0_13 = arith.constant 0 : index
    %22 = vector.load %arg4[%c0_11, %c0_12, %c0_13] : memref<2x8x1xf32, #tpu.memory_space<vmem>>, vector<1x8x1xf32>
    %23 = vector.shape_cast %22 : vector<1x8x1xf32> to vector<8x1xf32>
    %24 = vector.shape_cast %21 : vector<8x1xf32> to vector<1x8x1xf32>
    tpu.vector_store %arg4[%c0_11, %c0_12, %c0_13], %24 {strides = array<i32>} : memref<2x8x1xf32, #tpu.memory_space<vmem>>, vector<1x8x1xf32>,
    %c1 = arith.constant 1 : index
    %c0_14 = arith.constant 0 : index
    %c0_15 = arith.constant 0 : index
    %25 = vector.load %arg1[%c1, %c0_14, %c0_15] : memref<2x4x16xf32, #tpu.memory_space<vmem>>, vector<1x4x16xf32>
    %26 = vector.shape_cast %25 : vector<1x4x16xf32> to vector<4x16xf32>
    %cst_16 = arith.constant 0.000000e+00 : f32
    %27 = vector.broadcast %cst_16 : f32 to vector<4x1xf32>
    %28 = tpu.concatenate %27, %26, %27 in 1 : vector<4x1xf32>, vector<4x16xf32>, vector<4x1xf32> -> vector<4x18xf32>
    %29 = vector.extract_strided_slice %28 {offsets = [0, 0], sizes = [4, 16], strides = [1, 1]} : vector<4x18xf32> to vector<4x16xf32>
    %30 = vector.extract_strided_slice %28 {offsets = [0, 1], sizes = [4, 16], strides = [1, 1]} : vector<4x18xf32> to vector<4x16xf32>
    %31 = vector.extract_strided_slice %28 {offsets = [0, 2], sizes = [4, 16], strides = [1, 1]} : vector<4x18xf32> to vector<4x16xf32>
    %32 = tpu.concatenate %29, %30, %31 in 0 : vector<4x16xf32>, vector<4x16xf32>, vector<4x16xf32> -> vector<12x16xf32>
    %c0_17 = arith.constant 0 : index
    %c0_18 = arith.constant 0 : index
    %33 = vector.load %arg2[%c0_17, %c0_18] : memref<8x12xf32, #tpu.memory_space<vmem>>, vector<8x12xf32>
    %cst_19 = arith.constant dense<0.000000e+00> : vector<8x16xf32>
    %34 = tpu.matmul %33, %32, %cst_19 {dimension_numbers = #tpu.dot_dimension_numbers<[1], [0], [0], [1], [0, 0, 1, 1], [], []>} : vector<8x12xf32>, vector<12x16xf32>, vector<8x16xf32> -> vector<8x16xf32>
    %cst_20 = arith.constant dense<0.000000e+00> : vector<8xf32>
    %35 = vector.multi_reduction <add>, %34, %cst_20 [1] : vector<8x16xf32> to vector<8xf32>
    %36 = vector.shape_cast %35 : vector<8xf32> to vector<8x1xf32>
    %cst_21 = arith.constant 6.250000e-02 : f32
    %37 = vector.broadcast %cst_21 : f32 to vector<8x1xf32>
    %38 = arith.mulf %36, %37 : vector<8x1xf32>
    %39 = vector.broadcast %38 : vector<8x1xf32> to vector<8x16xf32>
    %40 = arith.subf %34, %39 : vector<8x16xf32>
    %c1_22 = arith.constant 1 : index
    %c0_23 = arith.constant 0 : index
    %c0_24 = arith.constant 0 : index
    %41 = vector.load %arg3[%c1_22, %c0_23, %c0_24] : memref<2x8x1xf32, #tpu.memory_space<vmem>>, vector<1x8x1xf32>
    %42 = vector.shape_cast %41 : vector<1x8x1xf32> to vector<8x1xf32>
    %43 = vector.shape_cast %36 : vector<8x1xf32> to vector<1x8x1xf32>
    tpu.vector_store %arg3[%c1_22, %c0_23, %c0_24], %43 {strides = array<i32>} : memref<2x8x1xf32, #tpu.memory_space<vmem>>, vector<1x8x1xf32>,
    %44 = arith.mulf %40, %40 : vector<8x16xf32>
    %cst_25 = arith.constant dense<0.000000e+00> : vector<8xf32>
    %45 = vector.multi_reduction <add>, %44, %cst_25 [1] : vector<8x16xf32> to vector<8xf32>
    %46 = vector.shape_cast %45 : vector<8xf32> to vector<8x1xf32>
    %c1_26 = arith.constant 1 : index
    %c0_27 = arith.constant 0 : index
    %c0_28 = arith.constant 0 : index
    %47 = vector.load %arg4[%c1_26, %c0_27, %c0_28] : memref<2x8x1xf32, #tpu.memory_space<vmem>>, vector<1x8x1xf32>
    %48 = vector.shape_cast %47 : vector<1x8x1xf32> to vector<8x1xf32>
    %49 = vector.shape_cast %46 : vector<8x1xf32> to vector<1x8x1xf32>
    tpu.vector_store %arg4[%c1_26, %c0_27, %c0_28], %49 {strides = array<i32>} : memref<2x8x1xf32, #tpu.memory_space<vmem>>, vector<1x8x1xf32>,
    return
  }
  func.func @transform_0(%arg0: i32) -> (i32, i32, i32) {
    %c0_i32 = arith.constant 0 : i32
    %c0_i32_0 = arith.constant 0 : i32
    %c0_i32_1 = arith.constant 0 : i32
    return %arg0, %c0_i32, %c0_i32_0 : i32, i32, i32
  }
  func.func @transform_1(%arg0: i32) -> (i32, i32) {
    %c0_i32 = arith.constant 0 : i32
    %c0_i32_0 = arith.constant 0 : i32
    %c0_i32_1 = arith.constant 0 : i32
    return %c0_i32, %c0_i32_0 : i32, i32
  }
  func.func @transform_2(%arg0: i32) -> (i32, i32, i32) {
    %c0_i32 = arith.constant 0 : i32
    %c0_i32_0 = arith.constant 0 : i32
    %c0_i32_1 = arith.constant 0 : i32
    return %arg0, %c0_i32, %c0_i32_0 : i32, i32, i32
  }
  func.func @transform_3(%arg0: i32) -> (i32, i32, i32) {
    %c0_i32 = arith.constant 0 : i32
    %c0_i32_0 = arith.constant 0 : i32
    %c0_i32_1 = arith.constant 0 : i32
    return %arg0, %c0_i32, %c0_i32_0 : i32, i32, i32
  }
}

module attributes {stable_mosaic.version = 11 : i64} {
  func.func @_conv_affine_act_kernel(%arg0: i32, %arg1: memref<2x4x16xf32, #tpu.memory_space<vmem>>, %arg2: memref<8x12xf32, #tpu.memory_space<vmem>>, %arg3: memref<8x1xf32, #tpu.memory_space<vmem>>, %arg4: memref<8x1xf32, #tpu.memory_space<vmem>>, %arg5: memref<2x8x16xf32, #tpu.memory_space<vmem>>) attributes {dimension_semantics = [#tpu.dimension_semantics<parallel>], iteration_bounds = array<i64: 1>, scalar_prefetch = 0 : i64, scratch_operands = 0 : i64, tpu.core_type = #tpu.core_type<tc>, window_params = [{transform_indices = @transform_0, window_bounds = array<i64: 2, 4, 16>}, {pipeline_mode = #tpu.pipeline_mode<synchronous>, transform_indices = @transform_1, window_bounds = array<i64: 8, 12>}, {pipeline_mode = #tpu.pipeline_mode<synchronous>, transform_indices = @transform_2, window_bounds = array<i64: 8, 1>}, {pipeline_mode = #tpu.pipeline_mode<synchronous>, transform_indices = @transform_3, window_bounds = array<i64: 8, 1>}, {transform_indices = @transform_4, window_bounds = array<i64: 2, 8, 16>}]} {
    %c0 = arith.constant 0 : index
    %c0_0 = arith.constant 0 : index
    %0 = vector.load %arg3[%c0, %c0_0] : memref<8x1xf32, #tpu.memory_space<vmem>>, vector<8x1xf32>
    %c0_1 = arith.constant 0 : index
    %c0_2 = arith.constant 0 : index
    %1 = vector.load %arg4[%c0_1, %c0_2] : memref<8x1xf32, #tpu.memory_space<vmem>>, vector<8x1xf32>
    %c0_3 = arith.constant 0 : index
    %c0_4 = arith.constant 0 : index
    %c0_5 = arith.constant 0 : index
    %2 = vector.load %arg1[%c0_3, %c0_4, %c0_5] : memref<2x4x16xf32, #tpu.memory_space<vmem>>, vector<1x4x16xf32>
    %3 = vector.shape_cast %2 : vector<1x4x16xf32> to vector<4x16xf32>
    %cst = arith.constant 0.000000e+00 : f32
    %4 = vector.broadcast %cst : f32 to vector<4x1xf32>
    %5 = tpu.concatenate %4, %3, %4 in 1 : vector<4x1xf32>, vector<4x16xf32>, vector<4x1xf32> -> vector<4x18xf32>
    %6 = vector.extract_strided_slice %5 {offsets = [0, 0], sizes = [4, 16], strides = [1, 1]} : vector<4x18xf32> to vector<4x16xf32>
    %7 = vector.extract_strided_slice %5 {offsets = [0, 1], sizes = [4, 16], strides = [1, 1]} : vector<4x18xf32> to vector<4x16xf32>
    %8 = vector.extract_strided_slice %5 {offsets = [0, 2], sizes = [4, 16], strides = [1, 1]} : vector<4x18xf32> to vector<4x16xf32>
    %9 = tpu.concatenate %6, %7, %8 in 0 : vector<4x16xf32>, vector<4x16xf32>, vector<4x16xf32> -> vector<12x16xf32>
    %c0_6 = arith.constant 0 : index
    %c0_7 = arith.constant 0 : index
    %10 = vector.load %arg2[%c0_6, %c0_7] : memref<8x12xf32, #tpu.memory_space<vmem>>, vector<8x12xf32>
    %cst_8 = arith.constant dense<0.000000e+00> : vector<8x16xf32>
    %11 = tpu.matmul %10, %9, %cst_8 {dimension_numbers = #tpu.dot_dimension_numbers<[1], [0], [0], [1], [0, 0, 1, 1], [], []>} : vector<8x12xf32>, vector<12x16xf32>, vector<8x16xf32> -> vector<8x16xf32>
    %12 = vector.broadcast %0 : vector<8x1xf32> to vector<8x16xf32>
    %13 = arith.mulf %11, %12 : vector<8x16xf32>
    %14 = vector.broadcast %1 : vector<8x1xf32> to vector<8x16xf32>
    %15 = arith.addf %13, %14 : vector<8x16xf32>
    %cst_9 = arith.constant 0.000000e+00 : f32
    %16 = vector.broadcast %cst_9 : f32 to vector<8x16xf32>
    %17 = arith.maximumf %15, %16 : vector<8x16xf32>
    %c0_10 = arith.constant 0 : index
    %c0_11 = arith.constant 0 : index
    %c0_12 = arith.constant 0 : index
    %18 = vector.load %arg5[%c0_10, %c0_11, %c0_12] : memref<2x8x16xf32, #tpu.memory_space<vmem>>, vector<1x8x16xf32>
    %19 = vector.shape_cast %18 : vector<1x8x16xf32> to vector<8x16xf32>
    %20 = vector.shape_cast %17 : vector<8x16xf32> to vector<1x8x16xf32>
    tpu.vector_store %arg5[%c0_10, %c0_11, %c0_12], %20 {strides = array<i32>} : memref<2x8x16xf32, #tpu.memory_space<vmem>>, vector<1x8x16xf32>,
    %c1 = arith.constant 1 : index
    %c0_13 = arith.constant 0 : index
    %c0_14 = arith.constant 0 : index
    %21 = vector.load %arg1[%c1, %c0_13, %c0_14] : memref<2x4x16xf32, #tpu.memory_space<vmem>>, vector<1x4x16xf32>
    %22 = vector.shape_cast %21 : vector<1x4x16xf32> to vector<4x16xf32>
    %cst_15 = arith.constant 0.000000e+00 : f32
    %23 = vector.broadcast %cst_15 : f32 to vector<4x1xf32>
    %24 = tpu.concatenate %23, %22, %23 in 1 : vector<4x1xf32>, vector<4x16xf32>, vector<4x1xf32> -> vector<4x18xf32>
    %25 = vector.extract_strided_slice %24 {offsets = [0, 0], sizes = [4, 16], strides = [1, 1]} : vector<4x18xf32> to vector<4x16xf32>
    %26 = vector.extract_strided_slice %24 {offsets = [0, 1], sizes = [4, 16], strides = [1, 1]} : vector<4x18xf32> to vector<4x16xf32>
    %27 = vector.extract_strided_slice %24 {offsets = [0, 2], sizes = [4, 16], strides = [1, 1]} : vector<4x18xf32> to vector<4x16xf32>
    %28 = tpu.concatenate %25, %26, %27 in 0 : vector<4x16xf32>, vector<4x16xf32>, vector<4x16xf32> -> vector<12x16xf32>
    %c0_16 = arith.constant 0 : index
    %c0_17 = arith.constant 0 : index
    %29 = vector.load %arg2[%c0_16, %c0_17] : memref<8x12xf32, #tpu.memory_space<vmem>>, vector<8x12xf32>
    %cst_18 = arith.constant dense<0.000000e+00> : vector<8x16xf32>
    %30 = tpu.matmul %29, %28, %cst_18 {dimension_numbers = #tpu.dot_dimension_numbers<[1], [0], [0], [1], [0, 0, 1, 1], [], []>} : vector<8x12xf32>, vector<12x16xf32>, vector<8x16xf32> -> vector<8x16xf32>
    %31 = vector.broadcast %0 : vector<8x1xf32> to vector<8x16xf32>
    %32 = arith.mulf %30, %31 : vector<8x16xf32>
    %33 = vector.broadcast %1 : vector<8x1xf32> to vector<8x16xf32>
    %34 = arith.addf %32, %33 : vector<8x16xf32>
    %cst_19 = arith.constant 0.000000e+00 : f32
    %35 = vector.broadcast %cst_19 : f32 to vector<8x16xf32>
    %36 = arith.maximumf %34, %35 : vector<8x16xf32>
    %c1_20 = arith.constant 1 : index
    %c0_21 = arith.constant 0 : index
    %c0_22 = arith.constant 0 : index
    %37 = vector.load %arg5[%c1_20, %c0_21, %c0_22] : memref<2x8x16xf32, #tpu.memory_space<vmem>>, vector<1x8x16xf32>
    %38 = vector.shape_cast %37 : vector<1x8x16xf32> to vector<8x16xf32>
    %39 = vector.shape_cast %36 : vector<8x16xf32> to vector<1x8x16xf32>
    tpu.vector_store %arg5[%c1_20, %c0_21, %c0_22], %39 {strides = array<i32>} : memref<2x8x16xf32, #tpu.memory_space<vmem>>, vector<1x8x16xf32>,
    return
  }
  func.func @transform_0(%arg0: i32) -> (i32, i32, i32) {
    %c0_i32 = arith.constant 0 : i32
    %c0_i32_0 = arith.constant 0 : i32
    %c0_i32_1 = arith.constant 0 : i32
    return %arg0, %c0_i32, %c0_i32_0 : i32, i32, i32
  }
  func.func @transform_1(%arg0: i32) -> (i32, i32) {
    %c0_i32 = arith.constant 0 : i32
    %c0_i32_0 = arith.constant 0 : i32
    %c0_i32_1 = arith.constant 0 : i32
    return %c0_i32, %c0_i32_0 : i32, i32
  }
  func.func @transform_2(%arg0: i32) -> (i32, i32) {
    %c0_i32 = arith.constant 0 : i32
    %c0_i32_0 = arith.constant 0 : i32
    %c0_i32_1 = arith.constant 0 : i32
    return %c0_i32, %c0_i32_0 : i32, i32
  }
  func.func @transform_3(%arg0: i32) -> (i32, i32) {
    %c0_i32 = arith.constant 0 : i32
    %c0_i32_0 = arith.constant 0 : i32
    %c0_i32_1 = arith.constant 0 : i32
    return %c0_i32, %c0_i32_0 : i32, i32
  }
  func.func @transform_4(%arg0: i32) -> (i32, i32, i32) {
    %c0_i32 = arith.constant 0 : i32
    %c0_i32_0 = arith.constant 0 : i32
    %c0_i32_1 = arith.constant 0 : i32
    return %arg0, %c0_i32, %c0_i32_0 : i32, i32, i32
  }
}

</mosaic_0001>

<bundles_post_ra>
// kernel: conv_block_forward.2
= control target key start
LH: loop header
LB: loop body
LE: loop exit
PB: predicated region body
PF: predicated region fallthrough
CT: control target
= control target key end

     0   :  { %s148_s14 = smov 1   ;;  %vm18_vm0 = vcmask 7168   ;;  %vm20_vm1 = vcmask 138240   ;;  %s149_s17 = smov 126   ;;  %vm29_vm2 = vcmask 1043456   ;;  %vm32_vm3 = vcmask 97280   ;;  %s202_s0 = inlined_call_operand.vmem [shape: f32[2,4,16], index: 0, kind: input, shape index: {}]   ;;  %s203_s1 = inlined_call_operand.vmem [shape: f32[8,12], index: 1, kind: input, shape index: {}]   ;;  %s204_s2 = inlined_call_operand.vmem [shape: f32[2,8,1], index: 2, kind: output, shape index: {0}]   ;;  %s205_s3 = inlined_call_operand.vmem [shape: f32[2,8,1], index: 3, kind: output, shape index: {1}]  }
   0x1   :  { %v13_v0 = vld [vmem:[%s202_s0] sm:$0xf]  ;;  %v135_v1 = vld [vmem:[%s202_s0 + $0x4] sm:$0xf]  ;;  %s150_s18 = smov 127   ;;  %vm58_vm4 = vcmask 130048  }
   0x2   :  { %15 = vrot.lane.b32.xlu0 %v13_v0, %s148_s14  ;;  %v31_v14 = vld [vmem:[%s203_s1] sm:$0xff] }
   0xa   :  { %73 = vrot.lane.b32.xlu0 %v135_v1, %s148_s14 }
  0x74   :  { %v16_v2 = vpop.permute.xlu0 %15 }
  0x75   :  { %v19_v3 = vsel %vm18_vm0, 0.0, %v16_v2 }
  0x76   :  { %v21_v4 = vsel %vm20_vm1, %v19_v3, 0.0 }
  0x77   :  { %27 = vrot.lane.b32.xlu1 %v21_v4, %s149_s17  ;;  %v23_v8 = vrot.slane %v21_v4, 4 }
  0x7c   :  { %v74_v5 = vpop.permute.xlu0 %73 }
  0x7d   :  { %v76_v6 = vsel %vm18_vm0, 0.0, %v74_v5 }
  0x7e   :  { %v77_v7 = vsel %vm20_vm1, %v76_v6, 0.0 }
  0x7f   :  { %83 = vrot.lane.b32.xlu1 %v77_v7, %s149_s17  ;;  %v79_v9 = vrot.slane %v77_v7, 4 }
  0x81   :  { %v143_v10 = vpack.i.bf16 %v79_v9, %v23_v8 }
  0x83   :  { %144 = vrot.lane.b32.xlu2 %v143_v10, %s150_s18 }
  0xdd   :  { %v145_v11 = vpop.permute.xlu2 %144 }
  0xde   :  { %v146_v12 = vunpack.i.l.bf16 %v145_v11  ;;  %v147_v16 = vunpack.i.h.bf16 %v145_v11 }
  0xe0   :  { %v30_v15 = vsel %vm29_vm2, %v21_v4, %v146_v12  ;;  %v85_v18 = vsel %vm29_vm2, %v77_v7, %v147_v16 }
  0xe9   :  { %v28_v13 = vpop.permute.xlu1 %27 }
  0xea   :  { %133 = vmatpush.msk.msra.mxu0 %vm29_vm2, %v28_v13 }
  0xec   :  { %53 = vmatpush.msra.mxu0 %v30_v15 }
  0xed   :  { %134 = vmatmul.msk.f32.vlgmr.msra.gmra.mxu0 %vm32_vm3, %v31_v14 }
  0xf1   :  { %v84_v17 = vpop.permute.xlu1 %83 }
  0xf2   :  { %136 = vmatpush.msk.msra.mxu1 %vm29_vm2, %v84_v17 }
  0xf4   :  { %107 = vmatpush.msra.mxu1 %v85_v18 }
  0xf5   :  { %137 = vmatmul.msk.f32.vlgmr.msra.gmra.mxu1 %vm32_vm3, %v31_v14 }
 0x16a   :  { %v55_v19 = vpop.f32.mrf.mxu0 }
 0x16b   :  { %v59_v20 = vsel %vm58_vm4, %v55_v19, 0.0 }
 0x16c   :  { %60 = vadd.xlane.f32.xlu2 %v59_v20 }
 0x172   :  { %v109_v21 = vpop.f32.mrf.mxu1 }
 0x173   :  { %v112_v22 = vsel %vm58_vm4, %v109_v21, 0.0 }
 0x174   :  { %113 = vadd.xlane.f32.xlu0 %v112_v22 }
 0x1df   :  { %v61_v23 = vpop.xlane.xlu2 %60 }
 0x1e0   :  { %v62_v24 = vmul.f32 0.0625, %v61_v23  ;;  %64 = vst.msk [vmem:[%s204_s2] sm:$0xff] %vm18_vm0, %v61_v23 }
 0x1e2   :  { %v63_v25 = vsub.f32 %v55_v19, %v62_v24 }
 0x1e4   :  { %v65_v26 = vmul.f32 %v63_v25, %v63_v25 }
 0x1e6   :  { %v66_v27 = vsel %vm58_vm4, %v65_v26, 0.0 }
 0x1e7   :  { %v114_v28 = vpop.xlane.xlu0 %113  ;;  %67 = vadd.xlane.f32.xlu1 %v66_v27 }
 0x1e8   :  { %v115_v29 = vmul.f32 0.0625, %v114_v28  ;;  %138 = vst.msk [vmem:[%s204_s2 + $0x8] sm:$0xff] %vm18_vm0, %v114_v28 }
 0x1ea   :  { %v116_v30 = vsub.f32 %v109_v21, %v115_v29 }
 0x1ec   :  { %v119_v31 = vmul.f32 %v116_v30, %v116_v30 }
 0x1ee   :  { %v120_v32 = vsel %vm58_vm4, %v119_v31, 0.0 }
 0x1ef   :  { %121 = vadd.xlane.f32.xlu2 %v120_v32 }
 0x25a   :  { %v68_v33 = vpop.xlane.xlu1 %67 }
 0x25b   :  { %69 = vst.msk [vmem:[%s205_s3] sm:$0xff] %vm18_vm0, %v68_v33 }
 0x262   :  { %v122_v34 = vpop.xlane.xlu2 %121 }
 0x263   :  { %139 = vst.msk [vmem:[%s205_s3 + $0x8] sm:$0xff] %vm18_vm0, %v122_v34 }

// kernel: conv_block_forward.3
= control target key start
LH: loop header
LB: loop body
LE: loop exit
PB: predicated region body
PF: predicated region fallthrough
CT: control target
= control target key end

     0   :  { %s190_s17 = smov 1   ;;  %s240_s0 = inlined_call_operand.vmem [shape: f32[2,4,16], index: 0, kind: input, shape index: {}]   ;;  %s241_s1 = inlined_call_operand.vmem [shape: f32[8,12], index: 1, kind: input, shape index: {}]   ;;  %s242_s2 = inlined_call_operand.vmem [shape: f32[8,1], index: 2, kind: input, shape index: {}]   ;;  %s243_s3 = inlined_call_operand.vmem [shape: f32[8,1], index: 3, kind: input, shape index: {}]   ;;  %s244_s4 = inlined_call_operand.hbm [shape: f32[2,8,16], index: 4, kind: output, shape index: {}]  }
   0x1   :  { %v20_v0 = vld [vmem:[%s240_s0] sm:$0xf] }
   0x2   :  { %22 = vrot.lane.b32.xlu0 %v20_v0, %s190_s17 }
   0x3   :  { %9 = vsyncpa [#allocation3], 0  ;;  %v147_v1 = vld [vmem:[%s240_s0 + $0x4] sm:$0xf]  ;;  %vm25_vm0 = vcmask 7168   ;;  %vm27_vm1 = vcmask 138240  }
   0x4   :  { %s191_s20 = smov 126   ;;  %s192_s21 = smov 127   ;;  %v19_v11 = vld [vmem:[%s243_s3] sm:$0xff]  ;;  %v193_v13 = vmov 0   ;;  %vm36_vm2 = vcmask 1043456   ;;  %vm39_vm3 = vcmask 97280  }
   0x5   :  { %v18_v12 = vld [vmem:[%s242_s2] sm:$0xff]  ;;  %163 = vset.pattern.permute.xlu0 %v193_v13  ;;  %162 = vset.pattern.permute.xlu2 %v193_v13  ;;  %vm78_vm4 = vcmask 130048   ;;  %s133_s28 = sshll.u32 %s244_s4, 4  ;;  %s195_s29 = smov 128   ;;  %s134_s28 = int_to_ptr.hbm [resolvable:$true] %s133_s28 }
   0x6   :  { %v38_v17 = vld [vmem:[%s241_s1] sm:$0xff]  ;;  %s194_s1 = smov [#allocation2]   ;;  %s196_s30 = smov 8  }
   0x7   :  { %s131_s2 = sshll.u32 %s194_s1, 4  ;;  %s132_s2 = int_to_ptr.vmem [resolvable:$true] %s131_s2 }
   0xa   :  { %83 = vrot.lane.b32.xlu0 %v147_v1, %s190_s17 }
  0x12   :  { %73 = vperm.xlu0 %163, %v19_v11  }
  0x74   :  { %v23_v2 = vpop.permute.xlu0 %22 }
  0x75   :  { %v26_v3 = vsel %vm25_vm0, 0.0, %v23_v2 }
  0x76   :  { %v28_v4 = vsel %vm27_vm1, %v26_v3, 0.0 }
  0x77   :  { %34 = vrot.lane.b32.xlu1 %v28_v4, %s191_s20  ;;  %v30_v8 = vrot.slane %v28_v4, 4 }
  0x7c   :  { %v84_v5 = vpop.permute.xlu0 %83 }
  0x7d   :  { %v86_v6 = vsel %vm25_vm0, 0.0, %v84_v5 }
  0x7e   :  { %v87_v7 = vsel %vm27_vm1, %v86_v6, 0.0 }
  0x7f   :  { %93 = vrot.lane.b32.xlu1 %v87_v7, %s191_s20  ;;  %v89_v9 = vrot.slane %v87_v7, 4 }
  0x81   :  { %v157_v10 = vpack.i.bf16 %v89_v9, %v30_v8 }
  0x83   :  { %158 = vrot.lane.b32.xlu2 %v157_v10, %s192_s21 }
  0x84   :  { %v74_v24 = vpop.permute.xlu0 %73 }
  0x8b   :  { %67 = vperm.xlu2 %162, %v18_v12  }
  0xdd   :  { %v159_v14 = vpop.permute.xlu2 %158 }
  0xde   :  { %v160_v15 = vunpack.i.l.bf16 %v159_v14  ;;  %v161_v19 = vunpack.i.h.bf16 %v159_v14 }
  0xe0   :  { %v37_v18 = vsel %vm36_vm2, %v28_v4, %v160_v15  ;;  %v95_v21 = vsel %vm36_vm2, %v87_v7, %v161_v19 }
  0xe5   :  { %v68_v22 = vpop.permute.xlu2 %67 }
  0xe9   :  { %v35_v16 = vpop.permute.xlu1 %34 }
  0xea   :  { %145 = vmatpush.msk.msra.mxu0 %vm36_vm2, %v35_v16 }
  0xec   :  { %60 = vmatpush.msra.mxu0 %v37_v18 }
  0xed   :  { %146 = vmatmul.msk.f32.vlgmr.msra.gmra.mxu0 %vm39_vm3, %v38_v17 }
  0xf1   :  { %v94_v20 = vpop.permute.xlu1 %93 }
  0xf2   :  { %148 = vmatpush.msk.msra.mxu1 %vm36_vm2, %v94_v20 }
  0xf4   :  { %117 = vmatpush.msra.mxu1 %v95_v21 }
  0xf5   :  { %149 = vmatmul.msk.f32.vlgmr.msra.gmra.mxu1 %vm39_vm3, %v38_v17 }
 0x16a   :  { %v62_v23 = vpop.f32.mrf.mxu0 }
 0x16b   :  { %v70_v25 = vmul.f32 %v68_v22, %v62_v23 }
 0x16d   :  { %v76_v26 = vadd.f32 %v74_v24, %v70_v25 }
 0x16f   :  { %v77_v27 = vmax.f32 %v76_v26, 0.0 }
 0x171   :  { %79 = vst.msk [vmem:[#allocation2] sm:$0xff] %vm78_vm4, %v77_v27 }
 0x172   :  { %v119_v28 = vpop.f32.mrf.mxu1 }
 0x173   :  { %v122_v29 = vmul.f32 %v119_v28, %v68_v22 }
 0x175   :  { %v123_v30 = vadd.f32 %v122_v29, %v74_v24 }
 0x177   :  { %v124_v31 = vmax.f32 %v123_v30, 0.0 }
 0x179   :  { %126 = vst.msk [vmem:[#allocation2 + $0x8] sm:$0xff] %vm78_vm4, %v124_v31 }
 0x17a   :  { %139 = dma.vmem_to_hbm [thread:$0]  %s132_s2, 256, %s134_s28, [#allocation3], %s195_s29, %s195_s29, %s196_s30  }
 0x17b   :  { %188 = dma.done.wait [#allocation3], 256  }
 0x17c   :  { %189 = vsyncadd [#allocation3], 4294967040 }
 0x17d   :  { %144 = vsyncpa [#allocation3], 1 }

</bundles_post_ra>
